<compile_context>
chip_gen: v7x
topology: tpu7x:2x2x1
jax: 0.10.0
libtpu: 0.0.40
codegen_flags: <defaults>
</compile_context>

<pallas_src>
import functools

import jax
import jax.numpy as jnp
from jax.experimental import pallas as pl
from jax.experimental.pallas import tpu as pltpu


# ----------------------------------------------------------------------------
# Round / RoundBit forward semantics: round-half-away-from-zero.
# Cheaper formulation than sign(x)*floor(|x|+0.5) (no sign/abs/mul chain).
# ----------------------------------------------------------------------------
def _round_away(x):
    return jnp.where(x >= 0, jnp.floor(x + 0.5), jnp.ceil(x - 0.5))


# ----------------------------------------------------------------------------
# Tile picker: largest tile <= target that divides dim and is a multiple of
# `align`; falls back to the full dim (always a legal BlockSpec block).
# ----------------------------------------------------------------------------
def _tile(dim, target, align):
    if dim <= target:
        return dim
    t = (target // align) * align
    while t >= align:
        if dim % t == 0:
            return t
        t -= align
    return dim


# ----------------------------------------------------------------------------
# Kernel 1: tiled linear  (F.linear: x @ W^T + b), optional fused tanh.
# ----------------------------------------------------------------------------
def _linear_kernel(x_ref, w_ref, b_ref, o_ref, acc_ref, *, activation):
    k = pl.program_id(2)

    @pl.when(k == 0)
    def _():
        acc_ref[...] = jnp.zeros_like(acc_ref)

    x = x_ref[...].astype(jnp.bfloat16)
    w = w_ref[...].astype(jnp.bfloat16)
    # Contract the K axis of W directly in its [N, K] PyTorch layout
    # (no .T -> no XLU/VMEM relayout before the MXU).
    acc_ref[...] += jax.lax.dot_general(
        x, w,
        dimension_numbers=(((1,), (1,)), ((), ())),
        preferred_element_type=jnp.float32)

    @pl.when(k == pl.num_programs(2) - 1)
    def _():
        out = acc_ref[...] + b_ref[...].astype(jnp.float32)
        if activation:
            out = jnp.tanh(out)
        o_ref[...] = out.astype(o_ref.dtype)


def linear(x, w, b, *, activation=False, out_dtype=jnp.float32,
           tm=256, tn=256, tk=512):
    # x: [M, K]  w: [N, K]  b: [N]  ->  [M, N]
    M, K = x.shape
    N = w.shape[0]
    tm = _tile(M, tm, 8)
    tn = _tile(N, tn, 128)
    tk = _tile(K, tk, 128)
    b2 = b.reshape(1, N).astype(jnp.float32)
    kernel = functools.partial(_linear_kernel, activation=activation)
    return pl.pallas_call(
        kernel,
        out_shape=jax.ShapeDtypeStruct((M, N), out_dtype),
        grid_spec=pltpu.PrefetchScalarGridSpec(
            num_scalar_prefetch=0,
            grid=(M // tm, N // tn, K // tk),
            in_specs=[
                pl.BlockSpec((tm, tk), lambda i, j, k: (i, k)),
                pl.BlockSpec((tn, tk), lambda i, j, k: (j, k)),
                pl.BlockSpec((1, tn), lambda i, j, k: (0, j)),
            ],
            out_specs=pl.BlockSpec((tm, tn), lambda i, j, k: (i, j)),
            scratch_shapes=[pltpu.VMEM((tm, tn), jnp.float32)],
        ),
        compiler_params=pltpu.CompilerParams(
            dimension_semantics=("parallel", "parallel", "arbitrary")),
        cost_estimate=pl.CostEstimate(
            flops=2 * M * N * K,
            transcendentals=M * N if activation else 0,
            bytes_accessed=4 * (M * K + N * K) + 2 * M * N),
    )(x, w, b2)


# ----------------------------------------------------------------------------
# Kernel 2: fused fake-quantize + linear + tanh.
# Weight tile is (tn, full K) so per-ROW min/max of the original fake_quantize
# is preserved exactly (no per-tile min/max approximation, no pre-pass).
# ----------------------------------------------------------------------------
def _quant_linear_kernel(bit_ref, x_ref, w_ref, b_ref, o_ref, *, activation):
    # --- fake quantization of the weight tile (f32, per-row asym) ---
    w = w_ref[...].astype(jnp.float32)                    # [tn, K]
    max_val = jnp.max(w, axis=1, keepdims=True)           # amax(dim=1, keepdim)
    min_val = jnp.min(w, axis=1, keepdims=True)           # amin(dim=1, keepdim)
    bit_i = jnp.clip(bit_ref[0], 1.0, 8.0)
    max_int = jnp.exp2(_round_away(bit_i)) - 1.0          # 2^RoundBit(bit) - 1
    scales = jnp.maximum(max_val - min_val, 1e-5) / max_int
    zeros = jnp.clip(-_round_away(min_val / scales), 0.0, max_int)
    wq = (jnp.clip(_round_away(w / scales) + zeros, 0.0, max_int) - zeros) * scales

    # --- matmul (bf16 operands, f32 accumulation) + bias + tanh epilogue ---
    x = x_ref[...].astype(jnp.bfloat16)
    acc = jax.lax.dot_general(
        x, wq.astype(jnp.bfloat16),
        dimension_numbers=(((1,), (1,)), ((), ())),
        preferred_element_type=jnp.float32)
    out = acc + b_ref[...].astype(jnp.float32)
    if activation:
        out = jnp.tanh(out)
    o_ref[...] = out.astype(o_ref.dtype)


def quant_linear(x, w, b, bit_i, *, activation=True, out_dtype=jnp.bfloat16,
                 tm=256, tn=256):
    # x: [M, K]  w: [N, K]  b: [N]  bit_i: scalar  ->  [M, N]
    M, K = x.shape
    N = w.shape[0]
    tm = _tile(M, tm, 8)
    tn = _tile(N, tn, 128)
    bit_arr = jnp.reshape(bit_i, (1,)).astype(jnp.float32)
    b2 = b.reshape(1, N).astype(jnp.float32)
    kernel = functools.partial(_quant_linear_kernel, activation=activation)
    return pl.pallas_call(
        kernel,
        out_shape=jax.ShapeDtypeStruct((M, N), out_dtype),
        grid_spec=pltpu.PrefetchScalarGridSpec(
            num_scalar_prefetch=1,                 # bit -> SMEM scalar
            grid=(M // tm, N // tn),
            in_specs=[
                pl.BlockSpec((tm, K), lambda i, j, bit: (i, 0)),
                pl.BlockSpec((tn, K), lambda i, j, bit: (j, 0)),
                pl.BlockSpec((1, tn), lambda i, j, bit: (0, j)),
            ],
            out_specs=pl.BlockSpec((tm, tn), lambda i, j, bit: (i, j)),
        ),
        compiler_params=pltpu.CompilerParams(
            dimension_semantics=("parallel", "parallel")),
        cost_estimate=pl.CostEstimate(
            flops=2 * M * N * K,
            transcendentals=M * N if activation else 0,
            bytes_accessed=4 * (M * K + N * K) + 2 * M * N),
    )(bit_arr, x, w, b2)


# ----------------------------------------------------------------------------
# Kernel 3: masked token log-probs (vocab-tiled online softmax + target gather).
# Consumes the FULL logits [B, S, V]; the shift-by-one is done by passing
# zero-padded targets/mask, so no [B, S-1, V] slice is materialized in HBM.
# Returns [B, S] with the last position always zero (mask-padded).
# ----------------------------------------------------------------------------
def _token_logprob_kernel(logits_ref, tgt_ref, mask_ref, out_ref,
                          m_ref, l_ref, t_ref):
    v = pl.program_id(1)

    @pl.when(v == 0)
    def _():
        m_ref[...] = jnp.full_like(m_ref, -jnp.inf)
        l_ref[...] = jnp.zeros_like(l_ref)
        t_ref[...] = jnp.zeros_like(t_ref)

    chunk = logits_ref[...].astype(jnp.float32)            # [tb, S, tv]
    tb, S, tv = chunk.shape

    # online log-sum-exp over vocab chunks
    m_old = m_ref[...]
    m_new = jnp.maximum(m_old, jnp.max(chunk, axis=-1))
    alpha = jnp.exp(m_old - m_new)
    l_ref[...] = l_ref[...] * alpha + jnp.sum(
        jnp.exp(chunk - m_new[..., None]), axis=-1)
    m_ref[...] = m_new

    # masked-select gather of the target logit (target hits exactly one chunk;
    # out-of-vocab / padded targets never match -> contribute 0, masked anyway)
    lane = jax.lax.broadcasted_iota(jnp.int32, (tb, S, tv), 2) + v * tv
    hit = lane == tgt_ref[...][..., None]
    t_ref[...] += jnp.sum(jnp.where(hit, chunk, 0.0), axis=-1)

    @pl.when(v == pl.num_programs(1) - 1)
    def _():
        lse = m_ref[...] + jnp.log(l_ref[...])
        out_ref[...] = (t_ref[...] - lse) * mask_ref[...]


def token_logprobs(logits, input_ids, attention_mask, *, tb=8, tv=2048):
    B, S, V = logits.shape
    # shift targets/mask by one and zero-pad the last position (mask=0 there)
    tgt = jnp.concatenate(
        [input_ids[:, 1:], jnp.zeros((B, 1), input_ids.dtype)], axis=1
    ).astype(jnp.int32)
    mask = jnp.concatenate(
        [attention_mask[:, 1:], jnp.zeros((B, 1), attention_mask.dtype)], axis=1
    ).astype(jnp.float32)
    tb = _tile(B, tb, 1)
    tv = _tile(V, tv, 128)
    return pl.pallas_call(
        _token_logprob_kernel,
        out_shape=jax.ShapeDtypeStruct((B, S), jnp.float32),
        grid_spec=pltpu.PrefetchScalarGridSpec(
            num_scalar_prefetch=0,
            grid=(B // tb, V // tv),
            in_specs=[
                pl.BlockSpec((tb, S, tv), lambda b, v: (b, 0, v)),
                pl.BlockSpec((tb, S), lambda b, v: (b, 0)),
                pl.BlockSpec((tb, S), lambda b, v: (b, 0)),
            ],
            out_specs=pl.BlockSpec((tb, S), lambda b, v: (b, 0)),
            scratch_shapes=[pltpu.VMEM((tb, S), jnp.float32)] * 3,
        ),
        compiler_params=pltpu.CompilerParams(
            dimension_semantics=("parallel", "arbitrary")),
    )(logits, tgt, mask)


# ----------------------------------------------------------------------------
# Synthetic tiny LM (stand-in for `model`): embedding -> 3 Linear(H,H) + tanh
# -> lm_head Linear(H,V).  The 3 hidden Linears are the quantized modules;
# lm_head is excluded (name contains 'lm_head' in the original).
# ----------------------------------------------------------------------------
def init_params(key, vocab, hidden, n_layers):
    keys = jax.random.split(key, 2 * n_layers + 2)
    emb = 0.1 * jax.random.normal(keys[0], (vocab, hidden), jnp.float32)
    layers = []
    for l in range(n_layers):
        w = 0.2 * jax.random.normal(keys[1 + 2 * l], (hidden, hidden), jnp.float32)
        b = 0.01 * jax.random.normal(keys[2 + 2 * l], (hidden,), jnp.float32)
        layers.append((w, b))
    lm_w = 0.1 * jax.random.normal(keys[-1], (vocab, hidden), jnp.float32)
    lm_b = jnp.zeros((vocab,), jnp.float32)
    return emb, layers, (lm_w, lm_b)


def model_forward(params, input_ids, bit=None):
    emb, layers, (lm_w, lm_b) = params
    B, S = input_ids.shape
    H = emb.shape[1]
    # bf16 activations (mirrors the autocast mixed-precision matmuls); the
    # logits matmul output stays f32 for log-softmax parity.
    x = jnp.take(emb, input_ids, axis=0).reshape(B * S, H).astype(jnp.bfloat16)
    for idx, (w, b) in enumerate(layers):
        if bit is None:
            x = linear(x, w, b, activation=True, out_dtype=jnp.bfloat16)
        else:
            x = quant_linear(x, w, b, bit[idx], activation=True,
                             out_dtype=jnp.bfloat16)
    logits = linear(x, lm_w, lm_b, activation=False, out_dtype=jnp.float32)
    return logits.reshape(B, S, -1)


# ----------------------------------------------------------------------------
# QuantWrapper.forward
# ----------------------------------------------------------------------------
def quant_wrapper_forward(params, bit, inputs, expect_acc, orig_acc, quant_acc):
    input_ids = inputs["input_ids"]
    attention_mask = inputs["attention_mask"]
    labels = inputs["labels"]
    _, layers, _ = params

    # full-precision pass
    orig_out = model_forward(params, input_ids)
    # fake-quantized pass (quantization fused into the linear kernels)
    q_out = model_forward(params, input_ids, bit=bit)

    # masked per-token logprobs; last column is mask-padded zero
    orig_tlp = token_logprobs(orig_out, input_ids, attention_mask)   # [B, S]
    q_tlp = token_logprobs(q_out, input_ids, attention_mask)         # [B, S]
    orig_seq_logprobs = orig_tlp.sum(axis=1)
    q_seq_logprobs = q_tlp.sum(axis=1)

    # pair-wise accuracy bookkeeping
    batch_size = labels.shape[0] // 2
    gt_labels = jnp.where(labels[0::2] == 1, 0, 1)
    orig_pred = jnp.where(orig_seq_logprobs[0::2] < orig_seq_logprobs[1::2], 1, 0)
    quant_pred = jnp.where(q_seq_logprobs[0::2] < q_seq_logprobs[1::2], 1, 0)
    orig_correct = jnp.sum(orig_pred == gt_labels)
    quant_correct = jnp.sum(quant_pred == gt_labels)
    total_sample = batch_size

    # (expect_acc > orig_acc clamp in the original only affects a log message)

    # SFT loss on the quantized logits
    mask_sum = attention_mask[:, 1:].astype(jnp.float32).sum()
    sft_loss = (-q_tlp).sum() / mask_sum

    # weighted bit mean (beta = 0.0 in the original, kept for fidelity)
    weights = jnp.array([w.size for (w, _) in layers], dtype=jnp.float32)
    weighted_bit_mean = (bit.reshape(-1) * weights).sum() / weights.sum()
    beta = 0.0
    loss = sft_loss + beta * weighted_bit_mean

    return loss, orig_correct, quant_correct, total_sample


if __name__ == "__main__":
    VOCAB, HIDDEN, B, S, N_LAYERS = 256, 128, 4, 8, 3

    key = jax.random.PRNGKey(0)
    k_param, k_ids = jax.random.split(key)

    params = init_params(k_param, VOCAB, HIDDEN, N_LAYERS)
    input_ids = jax.random.randint(k_ids, (B, S), 0, VOCAB, dtype=jnp.int32)
    attention_mask = jnp.ones((B, S), jnp.float32).at[1, 6:].set(0.0)
    labels = jnp.array([1, 0, 0, 1], dtype=jnp.int32)   # pairs: (0,1) and (2,3)

    # deterministic stand-in for torch.load('mix_34_largebeta_bit_init.pth')
    bit = jnp.array([[3.3], [4.0], [5.7]], dtype=jnp.float32)   # (qlayer_num, 1)

    inputs = {"input_ids": input_ids, "attention_mask": attention_mask,
              "labels": labels}
    loss, orig_correct, quant_correct, total_sample = quant_wrapper_forward(
        params, bit, inputs, expect_acc=0.9, orig_acc=0.8, quant_acc=0.7
    )
    jax.block_until_ready((loss, orig_correct, quant_correct))
    print("KERNEL_OK")
</pallas_src>

<mosaic_0001>
module attributes {stable_mosaic.version = 11 : i64} {
  func.func @_linear_kernel(%arg0: i32, %arg1: i32, %arg2: i32, %arg3: memref<32x128xbf16, #tpu.memory_space<vmem>>, %arg4: memref<128x128xf32, #tpu.memory_space<vmem>>, %arg5: memref<1x128xf32, #tpu.memory_space<vmem>>, %arg6: memref<32x128xbf16, #tpu.memory_space<vmem>>, %arg7: memref<32x128xf32, #tpu.memory_space<vmem>>) attributes {dimension_semantics = [#tpu.dimension_semantics<parallel>, #tpu.dimension_semantics<parallel>, #tpu.dimension_semantics<arbitrary>], iteration_bounds = array<i64: 1, 1, 1>, scalar_prefetch = 0 : i64, scratch_operands = 1 : i64, tpu.core_type = #tpu.core_type<tc>, window_params = [{transform_indices = @transform_0, window_bounds = array<i64: 32, 128>}, {transform_indices = @transform_1, window_bounds = array<i64: 128, 128>}, {transform_indices = @transform_2, window_bounds = array<i64: 1, 128>}, {transform_indices = @transform_3, window_bounds = array<i64: 32, 128>}]} {
    %c0_i32 = arith.constant 0 : i32
    %0 = arith.cmpi eq, %arg2, %c0_i32 : i32
    %1 = arith.extui %0 : i1 to i32
    %c0_i32_0 = arith.constant 0 : i32
    %2 = arith.cmpi ne, %1, %c0_i32_0 : i32
    scf.if %2 {
      %cst_10 = arith.constant 0.000000e+00 : f32
      %13 = vector.broadcast %cst_10 : f32 to vector<32x128xf32>
      %c0_11 = arith.constant 0 : index
      %c0_12 = arith.constant 0 : index
      %14 = vector.load %arg7[%c0_11, %c0_12] : memref<32x128xf32, #tpu.memory_space<vmem>>, vector<32x128xf32>
      tpu.vector_store %arg7[%c0_11, %c0_12], %13 {strides = array<i32>} : memref<32x128xf32, #tpu.memory_space<vmem>>, vector<32x128xf32>,
    } else {
    }
    %c0 = arith.constant 0 : index
    %c0_1 = arith.constant 0 : index
    %3 = vector.load %arg3[%c0, %c0_1] : memref<32x128xbf16, #tpu.memory_space<vmem>>, vector<32x128xbf16>
    %c0_2 = arith.constant 0 : index
    %c0_3 = arith.constant 0 : index
    %4 = vector.load %arg4[%c0_2, %c0_3] : memref<128x128xf32, #tpu.memory_space<vmem>>, vector<128x128xf32>
    %5 = arith.truncf %4 : vector<128x128xf32> to vector<128x128xbf16>
    %c0_4 = arith.constant 0 : index
    %c0_5 = arith.constant 0 : index
    %6 = vector.load %arg7[%c0_4, %c0_5] : memref<32x128xf32, #tpu.memory_space<vmem>>, vector<32x128xf32>
    %cst = arith.constant dense<0.000000e+00> : vector<32x128xf32>
    %7 = tpu.matmul %3, %5, %cst {dimension_numbers = #tpu.dot_dimension_numbers<[1], [1], [0], [0], [0, 0, 1, 0], [], []>} : vector<32x128xbf16>, vector<128x128xbf16>, vector<32x128xf32> -> vector<32x128xf32>
    %8 = arith.addf %6, %7 : vector<32x128xf32>
    %c0_6 = arith.constant 0 : index
    %c0_7 = arith.constant 0 : index
    %9 = vector.load %arg7[%c0_6, %c0_7] : memref<32x128xf32, #tpu.memory_space<vmem>>, vector<32x128xf32>
    tpu.vector_store %arg7[%c0_6, %c0_7], %8 {strides = array<i32>} : memref<32x128xf32, #tpu.memory_space<vmem>>, vector<32x128xf32>,
    %c0_i32_8 = arith.constant 0 : i32
    %10 = arith.cmpi eq, %arg2, %c0_i32_8 : i32
    %11 = arith.extui %10 : i1 to i32
    %c0_i32_9 = arith.constant 0 : i32
    %12 = arith.cmpi ne, %11, %c0_i32_9 : i32
    scf.if %12 {
      %c0_10 = arith.constant 0 : index
      %c0_11 = arith.constant 0 : index
      %13 = vector.load %arg7[%c0_10, %c0_11] : memref<32x128xf32, #tpu.memory_space<vmem>>, vector<32x128xf32>
      %c0_12 = arith.constant 0 : index
      %c0_13 = arith.constant 0 : index
      %14 = vector.load %arg5[%c0_12, %c0_13] : memref<1x128xf32, #tpu.memory_space<vmem>>, vector<1x128xf32>
      %15 = vector.broadcast %14 : vector<1x128xf32> to vector<32x128xf32>
      %16 = arith.addf %13, %15 : vector<32x128xf32>
      %17 = math.tanh %16 : vector<32x128xf32>
      %18 = arith.truncf %17 : vector<32x128xf32> to vector<32x128xbf16>
      %c0_14 = arith.constant 0 : index
      %c0_15 = arith.constant 0 : index
      %19 = vector.load %arg6[%c0_14, %c0_15] : memref<32x128xbf16, #tpu.memory_space<vmem>>, vector<32x128xbf16>
      tpu.vector_store %arg6[%c0_14, %c0_15], %18 {strides = array<i32>} : memref<32x128xbf16, #tpu.memory_space<vmem>>, vector<32x128xbf16>,
    } else {
    }
    return
  }
  func.func @transform_0(%arg0: i32, %arg1: i32, %arg2: i32) -> (i32, i32) {
    %c0_i32 = arith.constant 0 : i32
    return %arg0, %arg2 : i32, i32
  }
  func.func @transform_1(%arg0: i32, %arg1: i32, %arg2: i32) -> (i32, i32) {
    %c0_i32 = arith.constant 0 : i32
    return %arg1, %arg2 : i32, i32
  }
  func.func @transform_2(%arg0: i32, %arg1: i32, %arg2: i32) -> (i32, i32) {
    %c0_i32 = arith.constant 0 : i32
    %c0_i32_0 = arith.constant 0 : i32
    return %c0_i32, %arg1 : i32, i32
  }
  func.func @transform_3(%arg0: i32, %arg1: i32, %arg2: i32) -> (i32, i32) {
    %c0_i32 = arith.constant 0 : i32
    return %arg0, %arg1 : i32, i32
  }
}

</mosaic_0001>

<bundles_post_ra>
// kernel: tpu_custom_call.1
= control target key start
LH: loop header
LB: loop body
LE: loop exit
PB: predicated region body
PF: predicated region fallthrough
CT: control target
= control target key end

     0   :  { %8 = vsyncpa [#allocation4], 0  ;;  %s426_s0 = inlined_call_operand.hbm [shape: bf16[32,128], index: 0, kind: input, shape index: {}]   ;;  %s427_s1 = inlined_call_operand.hbm [shape: f32[128,128], index: 1, kind: input, shape index: {}]   ;;  %s428_s2 = inlined_call_operand.vmem [shape: f32[1,128], index: 2, kind: input, shape index: {}]   ;;  %s429_s3 = inlined_call_operand.hbm [shape: bf16[32,128], index: 3, kind: output, shape index: {}]  }
   0x1   :  { %9 = vsyncpa [#allocation7], 0 }
   0x2   :  { %10 = vsyncpa [#allocation5], 0  ;;  %s354_s12 = smov [#allocation3]   ;;  %s282_s16 = scalar_lea.hbm %s426_s0, 256 }
   0x3   :  { %s16_s13 = sshll.u32 %s354_s12, 4  ;;  %p283_p0 = scmp.ne.s32.totalorder %s426_s0, %s282_s16  ;;  %s17_s13 = int_to_ptr.vmem [resolvable:$true] %s16_s13 }
   0x4   :  { %p286_p1 = scmp.lt.u32.totalorder %s282_s16, %s426_s0 }
   0x6   :  { %p288_p2 = pnand %p286_p1, %p283_p0 }
   0x8   :  { %291 = shalt.err (!%p288_p2)
}
   0x9   :  { %s292_s21 = scalar_lea.vmem %s17_s13, 256  ;;  %p297_p4 = scmp.lt.s32.totalorder %s17_s13, %s17_s13 }
   0xa   :  { %p293_p3 = scmp.ne.s32.totalorder %s17_s13, %s292_s21  ;;  %p298_p5 = scmp.lt.s32.totalorder %s292_s21, %s292_s21 }
   0xc   :  { %p299_p6 = por %p298_p5, %p297_p4 }
   0xe   :  { %p300_p7 = pnand %p299_p6, %p293_p3 }
  0x10   :  { %303 = shalt.err (!%p300_p7)
}
  0x11   :  { %s355_s22 = smov 64   ;;  %s356_s23 = smov 4  }
  0x12   :  { %22 = dma.hbm_to_vmem [thread:$0]  %s426_s0, 256, %s17_s13, [#allocation4], %s355_s22, %s355_s22, %s356_s23  }
  0x13   :  { %s357_s26 = smov [#allocation6]   ;;  %s304_s30 = scalar_lea.hbm %s427_s1, 2048 }
  0x14   :  { %s28_s27 = sshll.u32 %s357_s26, 4  ;;  %p305_p8 = scmp.ne.s32.totalorder %s427_s1, %s304_s30  ;;  %s29_s27 = int_to_ptr.vmem [resolvable:$true] %s28_s27 }
  0x15   :  { %p308_p9 = scmp.lt.u32.totalorder %s304_s30, %s427_s1 }
  0x17   :  { %p310_p10 = pnand %p308_p9, %p305_p8 }
  0x19   :  { %313 = shalt.err (!%p310_p10)
}
  0x1a   :  { %s314_s8 = scalar_lea.vmem %s29_s27, 2048  ;;  %p319_p12 = scmp.lt.s32.totalorder %s29_s27, %s29_s27 }
  0x1b   :  { %p315_p11 = scmp.ne.s32.totalorder %s29_s27, %s314_s8  ;;  %p320_p13 = scmp.lt.s32.totalorder %s314_s8, %s314_s8 }
  0x1d   :  { %p321_p0 = por %p320_p13, %p319_p12 }
  0x1f   :  { %p322_p1 = pnand %p321_p0, %p315_p11 }
  0x21   :  { %325 = shalt.err (!%p322_p1)
}
  0x22   :  { %s358_s0 = smov 128   ;;  %s359_s9 = smov 8  }
  0x23   :  { %34 = dma.hbm_to_vmem [thread:$0]  %s427_s1, 2048, %s29_s27, [#allocation7], %s358_s0, %s358_s0, %s359_s9  }
  0x24   :  { %348 = dma.done.wait [#allocation4], 256  }
  0x25   :  { %349 = vsyncadd [#allocation4], 4294967040 }
  0x26   :  { %350 = dma.done.wait [#allocation7], 2048  }
  0x27   :  { %351 = vsyncadd [#allocation7], 4294965248  ;;  %v56_v0 = vld [vmem:[#allocation6] sm:$0xff]  ;;  %v57_v1 = vld [vmem:[#allocation6 + $0x8] sm:$0xff]  ;;  %s360_s13 = smov [#allocation8]  }
  0x28   :  { %v58_v2 = vld [vmem:[#allocation6 + $0x10] sm:$0xff]  ;;  %v72_v3 = vpack.c.bf16 %v57_v1, %v56_v0  ;;  %v59_v4 = vld [vmem:[#allocation6 + $0x18] sm:$0xff]  ;;  %v60_v6 = vld [vmem:[#allocation6 + $0x20] sm:$0xff]  ;;  %s200_s14 = sshll.u32 %s360_s13, 4  ;;  %s201_s14 = int_to_ptr.vmem [resolvable:$true] %s200_s14 }
  0x29   :  { %v73_v5 = vpack.c.bf16 %v59_v4, %v58_v2  ;;  %v61_v7 = vld [vmem:[#allocation6 + $0x28] sm:$0xff]  ;;  %v272_v8 = vld [vmem:[#allocation3] sm:$0xff]   ;;  %v63_v11 = vld [vmem:[#allocation6 + $0x38] sm:$0xff]  ;;  %p331_p3 = scmp.lt.s32.totalorder %s201_s14, %s201_s14 }
  0x2a   :  { %245 = vmatprep.subr.bf16.mxu0 %v72_v3  ;;  %261 = vmatprep.mubr.bf16.mxu0 %v272_v8  ;;  %v74_v9 = vpack.c.bf16 %v61_v7, %v60_v6  ;;  %v62_v10 = vld [vmem:[#allocation6 + $0x30] sm:$0xff]  ;;  %v64_v13 = vld [vmem:[#allocation6 + $0x40] sm:$0xff]  ;;  %v65_v14 = vld [vmem:[#allocation6 + $0x48] sm:$0xff] }
  0x2b   :  { %246 = vmatpush3.bf16.xpose.msra.mxu0 %v72_v3  ;;  %v75_v12 = vpack.c.bf16 %v63_v11, %v62_v10  ;;  %v76_v15 = vpack.c.bf16 %v65_v14, %v64_v13  ;;  %v66_v16 = vld [vmem:[#allocation6 + $0x50] sm:$0xff]  ;;  %v67_v17 = vld [vmem:[#allocation6 + $0x58] sm:$0xff]  ;;  %v68_v19 = vld [vmem:[#allocation6 + $0x60] sm:$0xff] }
  0x2c   :  { %247 = vmatprep.subr.bf16.mxu0 %v73_v5  ;;  %v77_v18 = vpack.c.bf16 %v67_v17, %v66_v16  ;;  %v69_v20 = vld [vmem:[#allocation6 + $0x68] sm:$0xff]  ;;  %v70_v22 = vld [vmem:[#allocation6 + $0x70] sm:$0xff]  ;;  %v71_v23 = vld [vmem:[#allocation6 + $0x78] sm:$0xff] }
  0x2d   :  { %v78_v21 = vpack.c.bf16 %v69_v20, %v68_v19  ;;  %v79_v24 = vpack.c.bf16 %v71_v23, %v70_v22  ;;  %v273_v25 = vld [vmem:[#allocation3 + $0x8] sm:$0xff]   ;;  %v215_v26 = vld [vmem:[%s428_s2] ss:$0 sm:$0xff]  ;;  %s326_s2 = scalar_lea.vmem %s201_s14, 256 }
  0x2e   :  { %p327_p2 = scmp.ne.s32.totalorder %s201_s14, %s326_s2  ;;  %p332_p4 = scmp.lt.s32.totalorder %s326_s2, %s326_s2 }
  0x30   :  { %p333_p5 = por %p332_p4, %p331_p3 }
  0x32   :  { %p334_p6 = pnand %p333_p5, %p327_p2 }
  0x33   :  { %248 = vmatpush3.bf16.xpose.msra.mxu0 %v73_v5 }
  0x34   :  { %249 = vmatprep.subr.bf16.mxu0 %v74_v9 }
  0x3b   :  { %250 = vmatpush3.bf16.xpose.msra.mxu0 %v74_v9 }
  0x3c   :  { %251 = vmatprep.subr.bf16.mxu0 %v75_v12 }
  0x43   :  { %252 = vmatpush3.bf16.xpose.msra.mxu0 %v75_v12 }
  0x44   :  { %253 = vmatprep.subr.bf16.mxu0 %v76_v15 }
  0x4b   :  { %254 = vmatpush3.bf16.xpose.msra.mxu0 %v76_v15 }
  0x4c   :  { %255 = vmatprep.subr.bf16.mxu0 %v77_v18 }
  0x53   :  { %256 = vmatpush3.bf16.xpose.msra.mxu0 %v77_v18 }
  0x54   :  { %257 = vmatprep.subr.bf16.mxu0 %v78_v21 }
  0x5b   :  { %258 = vmatpush3.bf16.xpose.msra.mxu0 %v78_v21 }
  0x5c   :  { %259 = vmatprep.subr.bf16.mxu0 %v79_v24 }
  0x63   :  { %260 = vmatpush3.bf16.xpose.msra.mxu0 %v79_v24 }
  0x6a   :  { %262 = vmatmul.mubr.bf16.vlgmr.msra.gmra.mrb[0].mxu0 %v273_v25 }
 0x13d   :  { %v263_v27 = vpop.f32.mrb[0].mxu0 }
 0x13e   :  { %v169_v28 = vadd.f32 %v263_v27, %v215_v26  ;;  %v130_v29 = vpop.f32.mrb[1].mxu0 }
 0x13f   :  { %v167_v30 = vadd.f32 %v215_v26, %v130_v29  ;;  %v264_v31 = vpop.f32.mrb[2].mxu0 }
 0x140   :  { %274 = vtanh.f32 %v169_v28  ;;  %v170_v32 = vadd.f32 %v264_v31, %v215_v26  ;;  %v133_v33 = vpop.f32.mrb[3].mxu0 }
 0x141   :  { %276 = vtanh.f32 %v167_v30  ;;  %v168_v34 = vadd.f32 %v215_v26, %v133_v33 }
 0x142   :  { %278 = vtanh.f32 %v170_v32 }
 0x143   :  { %280 = vtanh.f32 %v168_v34 }
 0x14a   :  { %v275_v35 = vpop.eup %274 }
 0x14b   :  { %v277_v36 = vpop.eup %276 }
 0x14c   :  { %v279_v37 = vpop.eup %278 }
 0x14d   :  { %v281_v38 = vpop.eup %280  ;;  %v232_v39 = vpack.c.bf16 %v279_v37, %v275_v35 }
 0x14e   :  { %v227_v40 = vpack.c.bf16 %v281_v38, %v277_v36 }
 0x14f   :  { %234 = vst [vmem:[#allocation8 + $0x8] sm:$0xff] %v232_v39  }
 0x150   :  { %228 = vst [vmem:[#allocation8] sm:$0xff] %v227_v40  }
 0x151   :  { %337 = shalt.err (!%p334_p6)
}
 0x152   :  { %s338_s17 = scalar_lea.hbm %s429_s3, 256 }
 0x153   :  { %p339_p7 = scmp.ne.s32.totalorder %s429_s3, %s338_s17  ;;  %p342_p8 = scmp.lt.u32.totalorder %s338_s17, %s429_s3 }
 0x155   :  { %p344_p9 = pnand %p342_p8, %p339_p7 }
 0x157   :  { %347 = shalt.err (!%p344_p9)
}
 0x158   :  { %206 = dma.vmem_to_hbm [thread:$0]  %s201_s14, 256, %s429_s3, [#allocation5], %s355_s22, %s355_s22, %s356_s23  }
 0x159   :  { %352 = dma.done.wait [#allocation5], 256  }
 0x15a   :  { %353 = vsyncadd [#allocation5], 4294967040 }
 0x15b   :  { %210 = vsyncpa [#allocation4], 1 }
 0x15c   :  { %211 = vsyncpa [#allocation7], 1 }
 0x15d   :  { %212 = vsyncpa [#allocation5], 1 }

</bundles_post_ra>
